<compile_context>
chip_gen: v6e
topology: v6e:2x2x1
jax: 0.10.0
libtpu: 0.0.40
codegen_flags: <defaults>
</compile_context>

<pallas_src>
import functools
import math

import jax
import jax.numpy as jnp
import numpy as np
from jax import lax
from jax.experimental import pallas as pl
from jax.experimental.pallas import tpu as pltpu


# ----------------------------------------------------------------------------- kernel
def _rel_sin_pos_kernel(lane_tab_ref, out_ref, *, seq_len, rows_per_slab_row,
                        pad_row, block_rows):
    """Write one (block_rows, L) tile of the flattened, lane-dense output slab.

    lane_tab_ref: (3, L) f32, resident across the whole grid.
        row 0: freq[lane]   = exp(-k * log(1e4)/(half-1)), k = (lane % D) mod half
        row 1: phase[lane]  = 0.0 for the sin half, pi/2 for the cos half
        row 2: rowoff[lane] = lane // D  (logical-row offset inside one slab row)
    """
    i = pl.program_id(0)
    R, L = out_ref.shape

    freq = lane_tab_ref[0:1, :]      # (1, L)
    phase = lane_tab_ref[1:2, :]     # (1, L)
    rowoff = lane_tab_ref[2:3, :]    # (1, L)

    # Slab row index of each sublane in this tile.
    slab_row = lax.broadcasted_iota(jnp.int32, (R, 1), 0) + i * block_rows
    # Logical output row of every element (exact integers in f32).
    logical_row = slab_row.astype(jnp.float32) * float(rows_per_slab_row) + rowoff
    pos = logical_row - float(seq_len)          # relative position -seq_len .. seq_len-1

    angle = pos * freq + phase                  # VPU
    emb = jnp.sin(angle)                        # single EUP transcendental per element
    # Zero the output row that selects the table's padding_idx row (often out of range).
    emb = jnp.where(logical_row == float(pad_row), jnp.float32(0.0), emb)
    out_ref[...] = emb.astype(out_ref.dtype)


# ----------------------------------------------------------------------------- wrapper
def rel_sin_pos_embed(seq_len, embedding_dim, padding_idx, origin_shift,
                      out_dtype=jnp.float32, max_block_bytes=None):
    """Functional (stateless) Pallas forward. Returns (2*seq_len, embedding_dim)."""
    D = embedding_dim
    assert D % 2 == 0, "odd embedding_dim not implemented"
    assert D >= 4, "embedding_dim must be >= 4 (half_dim - 1 division guard)"
    half = D // 2
    n_rows = 2 * seq_len
    n_elems = n_rows * D

    # ---- pick the output slab lane width (lane-dense whenever possible) ----
    if D % 128 == 0:
        L = D                                   # already lane-dense
    elif (128 % D == 0) and (n_elems % 128 == 0):
        L = 128                                 # pack 128/D logical rows per slab row
    else:
        L = D                                   # fallback: masked (partial-lane) stores
    total_rows = n_elems // L
    rows_per_slab_row = L // D

    # ---- per-lane constants, computed once (kept resident across the grid) ----
    scale = math.log(10000.0) / (half - 1)
    lane = jnp.arange(L, dtype=jnp.int32)
    col = lane % D
    k = jnp.where(col < half, col, col - half).astype(jnp.float32)
    freq = jnp.exp(k * jnp.float32(-scale))
    phase = jnp.where(col < half, 0.0, math.pi / 2.0).astype(jnp.float32)
    rowoff = (lane // D).astype(jnp.float32)
    lane_tab = jnp.stack([freq, phase, rowoff], axis=0)          # (3, L) f32

    # ---- generation-aware row-tile sizing (biggest block within the VMEM budget) ----
    itemsize = int(np.dtype(out_dtype).itemsize)
    row_align = max(8, 32 // itemsize)          # 8 for f32, 16 for bf16
    if max_block_bytes is None:
        try:
            vmem_bytes = pltpu.get_tpu_info().vmem_capacity_bytes
        except Exception:
            vmem_bytes = 64 * 1024 * 1024       # conservative (v7x) fallback
        max_block_bytes = min(vmem_bytes // 8, 8 * 1024 * 1024)
    max_rows = max(row_align, max_block_bytes // (L * itemsize))
    if total_rows <= max_rows:
        block_rows = total_rows                 # whole output in one block
    else:
        block_rows = max(row_align, (max_rows // row_align) * row_align)
    grid = (pl.cdiv(total_rows, block_rows),)

    # Output row that corresponds to the table's padding_idx row.
    pad_row = padding_idx - origin_shift + seq_len

    kernel = functools.partial(
        _rel_sin_pos_kernel,
        seq_len=seq_len,
        rows_per_slab_row=rows_per_slab_row,
        pad_row=pad_row,
        block_rows=block_rows,
    )

    cost = pl.CostEstimate(
        flops=6 * n_elems,
        transcendentals=n_elems,
        bytes_accessed=n_elems * itemsize + int(lane_tab.size) * 4,
    )

    out = pl.pallas_call(
        kernel,
        out_shape=jax.ShapeDtypeStruct((total_rows, L), out_dtype),
        grid=grid,
        in_specs=[pl.BlockSpec((3, L), lambda i: (0, 0))],       # resident per-lane table
        out_specs=pl.BlockSpec((block_rows, L), lambda i: (i, 0)),
        compiler_params=pltpu.CompilerParams(
            dimension_semantics=("parallel",),
            vmem_limit_bytes=32 * 1024 * 1024,
        ),
        cost_estimate=cost,
    )(lane_tab)
    return out.reshape(n_rows, D)


class RelativeSinusoidalPositionalEmbedding:
    """Pallas port: forward(inputs[bsz, seq_len]) -> (2*seq_len, embedding_dim)."""

    def __init__(self, embedding_dim, padding_idx, init_size=1024):
        assert init_size % 2 == 0
        assert embedding_dim % 2 == 0   # TODO(synk): odd embedding_dim not implemented.
        assert embedding_dim >= 4       # guard: log(1e4)/(half_dim-1) division.
        self.embedding_dim = embedding_dim
        self.padding_idx = padding_idx
        # get_embedding(init_size + 1, ...) -> origin_shift = (init_size + 1)//2 + 1
        self.origin_shift = (init_size + 1) // 2 + 1

    def __call__(self, inputs):
        bsz, seq_len = inputs.shape
        max_pos = self.padding_idx + seq_len
        # Mirror PyTorch's stateful table growth exactly (the regenerated table sets
        # origin_shift = max_pos).  NOTE: this Python-level state is a JIT footgun;
        # the Pallas wrapper itself (rel_sin_pos_embed) is purely functional.
        if max_pos >= self.origin_shift:
            self.origin_shift = max_pos
        return rel_sin_pos_embed(seq_len, self.embedding_dim,
                                 self.padding_idx, self.origin_shift)


# ----------------------------------------------------------------------------- reference
def _reference(embedding_dim, padding_idx, seq_len, init_size=1024):
    """Plain-JAX replica of the PyTorch module (table build + index_select)."""
    num_embeddings = init_size + 1
    origin_shift = num_embeddings // 2 + 1
    max_pos = padding_idx + seq_len
    if max_pos >= origin_shift:
        num_embeddings = max_pos * 2
        origin_shift = max_pos
    half_dim = embedding_dim // 2
    emb_scale = math.log(10000.0) / (half_dim - 1)
    freqs = jnp.exp(jnp.arange(half_dim, dtype=jnp.float32) * -emb_scale)
    start = -((num_embeddings + 1) // 2)                  # floor(-n/2)
    pos_vals = jnp.arange(start, start + num_embeddings, dtype=jnp.float32)
    table = pos_vals[:, None] * freqs[None, :]
    table = jnp.concatenate([jnp.sin(table), jnp.cos(table)], axis=1)
    table = table.at[padding_idx, :].set(0.0)
    positions = jnp.arange(-seq_len, seq_len) + origin_shift
    return table[positions]


def _check(out, ref, atol):
    out = np.asarray(jax.block_until_ready(out))
    ref = np.asarray(ref)
    assert out.shape == ref.shape, (out.shape, ref.shape)
    assert np.allclose(out, ref, atol=atol, rtol=atol), float(np.abs(out - ref).max())


if __name__ == "__main__":
    key = jax.random.PRNGKey(0)

    # --- main case (matches the module's attention usage: head_dim=32) -------------
    bsz, seq_len = 2, 8
    embedding_dim, padding_idx = 32, 0
    # inputs are only used for their shape (bsz, seq_len), matching the PyTorch module
    inputs = jax.random.randint(key, (bsz, seq_len), 0, 100, dtype=jnp.int32)
    module = RelativeSinusoidalPositionalEmbedding(embedding_dim, padding_idx)
    out = jax.block_until_ready(module(inputs))
    assert out.shape == (2 * seq_len, embedding_dim)
    _check(out, _reference(embedding_dim, padding_idx, seq_len), atol=1e-4)

    # --- table-regeneration path (max_pos >= origin_shift -> padding row zeroed) ---
    module2 = RelativeSinusoidalPositionalEmbedding(32, 0, init_size=16)
    inputs2 = jnp.zeros((1, 12), dtype=jnp.int32)
    out2 = module2(inputs2)
    _check(out2, _reference(32, 0, 12, init_size=16), atol=1e-4)

    # --- larger, D % 128 == 0 path with a multi-step parallel grid -----------------
    out3 = rel_sin_pos_embed(256, 256, 0, (1024 + 1) // 2 + 1,
                             max_block_bytes=128 * 1024)   # force grid > 1
    _check(out3, _reference(256, 0, 256, init_size=1024), atol=5e-4)

    # --- fallback path (128 % D != 0 -> masked stores, still correct) --------------
    module4 = RelativeSinusoidalPositionalEmbedding(24, 0)
    out4 = module4(jnp.zeros((1, 8), dtype=jnp.int32))
    _check(out4, _reference(24, 0, 8), atol=1e-4)

    print("KERNEL_OK")
</pallas_src>

<mosaic_0001>
module attributes {stable_mosaic.version = 11 : i64} {
  func.func @_rel_sin_pos_kernel(%arg0: i32, %arg1: memref<3x128xf32, #tpu.memory_space<vmem>>, %arg2: memref<4x128xf32, #tpu.memory_space<vmem>>) attributes {dimension_semantics = [#tpu.dimension_semantics<parallel>], iteration_bounds = array<i64: 1>, scalar_prefetch = 0 : i64, scratch_operands = 0 : i64, tpu.core_type = #tpu.core_type<tc>, window_params = [{pipeline_mode = #tpu.pipeline_mode<synchronous>, transform_indices = @transform_0, window_bounds = array<i64: 3, 128>}, {transform_indices = @transform_1, window_bounds = array<i64: 4, 128>}]} {
    %c0 = arith.constant 0 : index
    %c0_0 = arith.constant 0 : index
    %0 = vector.load %arg1[%c0, %c0_0] : memref<3x128xf32, #tpu.memory_space<vmem>>, vector<1x128xf32>
    %c1 = arith.constant 1 : index
    %c0_1 = arith.constant 0 : index
    %1 = vector.load %arg1[%c1, %c0_1] : memref<3x128xf32, #tpu.memory_space<vmem>>, vector<1x128xf32>
    %c2 = arith.constant 2 : index
    %c0_2 = arith.constant 0 : index
    %2 = vector.load %arg1[%c2, %c0_2] : memref<3x128xf32, #tpu.memory_space<vmem>>, vector<1x128xf32>
    %3 = tpu.iota {dimensions = array<i32: 0>} : vector<4x1xi32>
    %c4_i32 = arith.constant 4 : i32
    %4 = arith.muli %arg0, %c4_i32 : i32
    %5 = vector.broadcast %4 : i32 to vector<4x1xi32>
    %6 = arith.addi %3, %5 : vector<4x1xi32>
    %7 = arith.sitofp %6 : vector<4x1xi32> to vector<4x1xf32>
    %cst = arith.constant 4.000000e+00 : f32
    %8 = vector.broadcast %cst : f32 to vector<4x1xf32>
    %9 = arith.mulf %7, %8 : vector<4x1xf32>
    %10 = vector.broadcast %9 : vector<4x1xf32> to vector<4x128xf32>
    %11 = vector.broadcast %2 : vector<1x128xf32> to vector<4x128xf32>
    %12 = arith.addf %10, %11 : vector<4x128xf32>
    %cst_3 = arith.constant 8.000000e+00 : f32
    %13 = vector.broadcast %cst_3 : f32 to vector<4x128xf32>
    %14 = arith.subf %12, %13 : vector<4x128xf32>
    %15 = vector.broadcast %0 : vector<1x128xf32> to vector<4x128xf32>
    %16 = arith.mulf %14, %15 : vector<4x128xf32>
    %17 = vector.broadcast %1 : vector<1x128xf32> to vector<4x128xf32>
    %18 = arith.addf %16, %17 : vector<4x128xf32>
    %19 = math.sin %18 : vector<4x128xf32>
    %cst_4 = arith.constant -5.050000e+02 : f32
    %20 = vector.broadcast %cst_4 : f32 to vector<4x128xf32>
    %21 = arith.cmpf oeq, %12, %20 : vector<4x128xf32>
    %cst_5 = arith.constant 0.000000e+00 : f32
    %22 = vector.broadcast %cst_5 : f32 to vector<4x128xf32>
    %23 = arith.select %21, %22, %19 : vector<4x128xi1>, vector<4x128xf32>
    %c0_6 = arith.constant 0 : index
    %c0_7 = arith.constant 0 : index
    %24 = vector.load %arg2[%c0_6, %c0_7] : memref<4x128xf32, #tpu.memory_space<vmem>>, vector<4x128xf32>
    tpu.vector_store %arg2[%c0_6, %c0_7], %23 {strides = array<i32>} : memref<4x128xf32, #tpu.memory_space<vmem>>, vector<4x128xf32>,
    return
  }
  func.func @transform_0(%arg0: i32) -> (i32, i32) {
    %c0_i32 = arith.constant 0 : i32
    %c0_i32_0 = arith.constant 0 : i32
    %c0_i32_1 = arith.constant 0 : i32
    return %c0_i32, %c0_i32_0 : i32, i32
  }
  func.func @transform_1(%arg0: i32) -> (i32, i32) {
    %c0_i32 = arith.constant 0 : i32
    %c0_i32_0 = arith.constant 0 : i32
    return %arg0, %c0_i32 : i32, i32
  }
}

</mosaic_0001>

<bundles_post_ra>
// kernel: tpu_custom_call.1
= control target key start
LH: loop header
LB: loop body
LE: loop exit
PB: predicated region body
PF: predicated region fallthrough
CT: control target
= control target key end

     0   :  { %6 = vsyncpa [#allocation3], 0  ;;  %s286_s0 = inlined_call_operand.hbm [shape: f32[3,128], index: 0, kind: input, shape index: {}]   ;;  %s287_s1 = inlined_call_operand.hbm [shape: f32[4,128], index: 1, kind: output, shape index: {}]  }
   0x1   :  { %7 = vsyncpa [#allocation4], 0  ;;  %s237_s6 = smov [#allocation2]  }
   0x2   :  { %s14_s7 = sshll.u32 %s237_s6, 4  ;;  %s15_s7 = int_to_ptr.vmem [resolvable:$true] %s14_s7 }
   0x3   :  { %s201_s8 = scalar_lea.vmem %s15_s7, 64  ;;  %p206_p1 = scmp.lt.s32.totalorder %s15_s7, %s15_s7 }
   0x4   :  { %p202_p0 = scmp.ne.s32.totalorder %s15_s7, %s201_s8  ;;  %p207_p2 = scmp.lt.s32.totalorder %s201_s8, %s201_s8 }
   0x6   :  { %p208_p3 = por %p207_p2, %p206_p1 }
   0x8   :  { %p209_p4 = pnand %p208_p3, %p202_p0 }
   0xa   :  { %212 = shalt.err (!%p209_p4)
}
   0xb   :  { %17 = dma.hbm_to_vmem [thread:$0]  %s286_s0, 64, %s15_s7, [#allocation3]  }
   0xc   :  { %233 = dma.done.wait [#allocation3], 64  }
   0xd   :  { %234 = vsyncadd [#allocation3], 4294967232  ;;  %v24_v0 = vlaneseq  ;;  %v169_v4 = vld [vmem:[#allocation2 + $0x2] ss:$0 sm:$0xff]  ;;  %v171_v6 = vld [vmem:[#allocation2] ss:$0 sm:$0xff] }
   0xe   :  { %v172_v8 = vld [vmem:[#allocation2 + $0x1] ss:$0 sm:$0xff]  ;;  %v238_v22 = vmov 683565275   ;;  %v239_v24 = vmov 2475754826  }
   0xf   :  { %v25_v1 = vshrl.u32 %v24_v0, 7  ;;  %v240_v26 = vmov 2131351028   ;;  %v241_v28 = vmov 2102212464   ;;  %s244_s0 = smov [#allocation5]  }
  0x10   :  { %v242_v30 = vmov 920167782   ;;  %v243_v37 = vmov 1326507024   ;;  %s160_s11 = sshll.u32 %s244_s0, 4  ;;  %s161_s11 = int_to_ptr.vmem [resolvable:$true] %s160_s11 }
  0x11   :  { %v29_v2 = vcvt.s32.f32 %v25_v1  ;;  %s213_s12 = scalar_lea.vmem %s161_s11, 64  ;;  %p218_p6 = scmp.lt.s32.totalorder %s161_s11, %s161_s11 }
  0x12   :  { %p214_p5 = scmp.ne.s32.totalorder %s161_s11, %s213_s12  ;;  %p219_p7 = scmp.lt.s32.totalorder %s213_s12, %s213_s12 }
  0x13   :  { %v30_v3 = vmul.f32 4.0, %v29_v2 }
  0x14   :  { %p220_p8 = por %p219_p7, %p218_p6 }
  0x15   :  { %v258_v5 = vadd.f32 %v169_v4, %v30_v3 }
  0x16   :  { %p221_p9 = pnand %p220_p8, %p214_p5 }
  0x17   :  { %v170_v7 = vadd.f32 -8.0, %v258_v5  ;;  %vm151_vm13 = vcmp.eq.f32.partialorder %v258_v5, -505.0 }
  0x19   :  { %v41_v9 = vmul.f32 %v171_v6, %v170_v7 }
  0x1b   :  { %v261_v10 = vadd.f32 %v172_v8, %v41_v9 }
  0x1d   :  { %v50_v11 = vand.u32 2139095040, %v261_v10  ;;  %v47_v13 = vand.u32 2147483647, %v261_v10  ;;  %vm49_vm7 = vcmp.lt.s32.totalorder %v261_v10, 0  ;;  %vm139_vm12 = vweird.f32 %v261_v10 }
  0x1f   :  { %v51_v12 = vshrl.u32 %v50_v11, 23  ;;  %v54_v16 = vand.u32 8388607, %v47_v13  ;;  %vm48_vm8 = vcmp.le.f32.partialorder %v47_v13, 0.7853982 }
  0x21   :  { %v173_v14 = vadd.s32 4294967169, %v51_v12  ;;  %v55_v19 = vor.u32 8388608, %v54_v16 }
  0x23   :  { %v57_v15 = vadd.s32 1, %v173_v14  ;;  %v95_v39 = vshll.u32 %v55_v19, 8 }
  0x25   :  { %vm58_vm0 = vcmp.gt.s32.totalorder %v57_v15, 0 }
  0x26   :  { %v59_v17 = vsel %vm58_vm0, %v57_v15, 0 }
  0x27   :  { %v61_v18 = vand.u32 31, %v59_v17  ;;  %v60_v20 = vshrl.u32 %v59_v17, 5 }
  0x29   :  { %v62_v21 = vsub.s32 32, %v61_v18  ;;  %v64_v23 = vshll.u32 %v238_v22, %v61_v18  ;;  %v67_v25 = vshll.u32 %v239_v24, %v61_v18  ;;  %v70_v27 = vshll.u32 %v240_v26, %v61_v18 }
  0x2a   :  { %v73_v29 = vshll.u32 %v241_v28, %v61_v18  ;;  %v76_v31 = vshll.u32 %v242_v30, %v61_v18  ;;  %vm79_vm1 = vcmp.lt.s32.totalorder %v60_v20, 1  ;;  %vm82_vm2 = vcmp.lt.s32.totalorder %v60_v20, 4 }
  0x2b   :  { %v63_v32 = vshrl.u32 %v238_v22, %v62_v21  ;;  %v65_v33 = vshrl.u32 %v239_v24, %v62_v21  ;;  %v68_v34 = vshrl.u32 %v240_v26, %v62_v21  ;;  %v71_v35 = vshrl.u32 %v241_v28, %v62_v21 }
  0x2c   :  { %v74_v36 = vshrl.u32 %v242_v30, %v62_v21  ;;  %v77_v38 = vshrl.u32 %v243_v37, %v62_v21  ;;  %vm80_vm3 = vcmp.lt.s32.totalorder %v60_v20, 2  ;;  %vm81_vm4 = vcmp.lt.s32.totalorder %v60_v20, 3 }
  0x2d   :  { %v66_v40 = vor.u32 %v65_v33, %v64_v23  ;;  %v69_v41 = vor.u32 %v68_v34, %v67_v25  ;;  %v72_v42 = vor.u32 %v71_v35, %v70_v27 }
  0x2e   :  { %v75_v43 = vor.u32 %v74_v36, %v73_v29  ;;  %v78_v44 = vor.u32 %v77_v38, %v76_v31 }
  0x2f   :  { %v83_v45 = vsel %vm79_vm1, %v63_v32, %v66_v40  ;;  %v84_v46 = vsel %vm82_vm2, %v72_v42, 2102212464  ;;  %v87_v47 = vsel %vm79_vm1, %v66_v40, %v69_v41  ;;  %v91_v48 = vsel %vm79_vm1, %v69_v41, %v72_v42 }
  0x30   :  { %v85_v49 = vsel %vm81_vm4, %v69_v41, %v84_v46  ;;  %v88_v50 = vsel %vm82_vm2, %v75_v43, 920167782  ;;  %v92_v51 = vsel %vm82_vm2, %v78_v44, 1326507024 }
  0x31   :  { %v89_v52 = vsel %vm81_vm4, %v72_v42, %v88_v50  ;;  %v93_v53 = vsel %vm81_vm4, %v75_v43, %v92_v51  ;;  %v86_v54 = vsel %vm80_vm3, %v83_v45, %v85_v49 }
  0x32   :  { %v90_v55 = vsel %vm80_vm3, %v87_v47, %v89_v52  ;;  %v94_v56 = vsel %vm80_vm3, %v91_v48, %v93_v53  ;;  %v102_v61 = vmul.u32 %v95_v39, %v86_v54 }
  0x33   :  { %v267_v57 = vmul.u32.u64.low %v95_v39, %v94_v56  ;;  %v268_v58 = vmul.u32.u64.high %v95_v39, %v94_v56, %v267_v57  ;;  %v270_v59 = vmul.u32.u64.low %v95_v39, %v90_v55  ;;  %v271_v60 = vmul.u32.u64.high %v95_v39, %v90_v55, %v270_v59 }
  0x35   :  { %vm104_vm5 = vc.u32 %v268_v58, %v270_v59  ;;  %v105_v62 = vadd.s32 1, %v271_v60  ;;  %v103_v11 = vadd.s32 %v270_v59, %v268_v58 }
  0x37   :  { %v106_v63 = vsel %vm104_vm5, %v105_v62, %v271_v60 }
  0x38   :  { %v107_v0 = vadd.s32 %v106_v63, %v102_v61 }
  0x3a   :  { %v108_v1 = vadd.s32 536870912, %v107_v0 }
  0x3c   :  { %v109_v2 = vshrl.u32 %v108_v1, 30 }
  0x3e   :  { %v110_v3 = vshll.u32 %v109_v2, 30  ;;  %v133_v25 = vsub.s32 4, %v109_v2 }
  0x40   :  { %v111_v4 = vsub.s32 %v107_v0, %v110_v3  ;;  %v134_v28 = vsel %vm49_vm7, %v133_v25, %v109_v2 }
  0x41   :  { %v136_v30 = vsel %vm48_vm8, 0, %v134_v28 }
  0x42   :  { %v113_v6 = vsub.s32 0, %v111_v4  ;;  %v140_v31 = vadd.s32 3, %v136_v30 }
  0x44   :  { %v174_v7 = vmin.u32 %v113_v6, %v111_v4  ;;  %v141_v32 = vand.u32 3, %v140_v31 }
  0x46   :  { %v115_v8 = vclz %v174_v7  ;;  %vm146_vm9 = vcmp.eq.s32.totalorder %v141_v32, 2  ;;  %vm143_vm10 = vcmp.eq.s32.totalorder %v141_v32, 0  ;;  %vm142_vm11 = vcmp.lt.s32.totalorder %v141_v32, 2 }
  0x48   :  { %v175_v9 = vadd.s32 4294967294, %v115_v8 }
  0x4a   :  { %vm176_vm6 = vcmp.lt.s32.totalorder %v175_v9, 0 }
  0x4b   :  { %v118_v12 = vsel %vm176_vm6, 0, %v175_v9 }
  0x4c   :  { %v119_v14 = vsub.s32 32, %v118_v12  ;;  %v120_v15 = vshll.u32 %v111_v4, %v118_v12  ;;  %v123_v16 = vsub.s32 4294967266, %v118_v12 }
  0x4e   :  { %v121_v17 = vshrl.u32 %v103_v11, %v119_v14  ;;  %v124_v18 = vadd.s32 127, %v123_v16 }
  0x50   :  { %v122_v19 = vor.u32 %v121_v17, %v120_v15  ;;  %v125_v20 = vshll.u32 %v124_v18, 23 }
  0x52   :  { %v126_v21 = vor.u32 4788187, %v125_v20  ;;  %v129_v22 = vcvt.s32.f32 %v122_v19 }
  0x54   :  { %v127_v23 = vand.u32 2147483647, %v126_v21 }
  0x56   :  { %v130_v24 = vmul.f32 %v129_v22, %v127_v23 }
  0x58   :  { %v131_v26 = vxor.u32 2147483648, %v130_v24 }
  0x5a   :  { %v132_v27 = vsel %vm49_vm7, %v131_v26, %v130_v24 }
  0x5b   :  { %v135_v29 = vsel %vm48_vm8, %v261_v10, %v132_v27 }
  0x5c   :  { %189 = vcosq.f32 %v135_v29 }
  0x5d   :  { %191 = vsinq.f32 %v135_v29 }
  0x69   :  { %v190_v33 = vpop.eup %189 }
  0x6a   :  { %v192_v34 = vpop.eup %191  ;;  %v147_v35 = vxor.u32 2147483648, %v190_v33 }
  0x6b   :  { %v144_v36 = vxor.u32 2147483648, %v192_v34 }
  0x6c   :  { %v148_v13 = vsel %vm146_vm9, %v147_v35, %v192_v34 }
  0x6d   :  { %v145_v37 = vsel %vm143_vm10, %v190_v33, %v144_v36 }
  0x6e   :  { %v149_v38 = vsel %vm142_vm11, %v145_v37, %v148_v13 }
  0x6f   :  { %v150_v39 = vsel %vm139_vm12, nan, %v149_v38 }
  0x70   :  { %v152_v40 = vsel %vm151_vm13, 0.0, %v150_v39 }
  0x71   :  { %153 = vst [vmem:[#allocation5] sm:$0xf] %v152_v40 }
  0x72   :  { %224 = shalt.err (!%p221_p9)
}
  0x73   :  { %163 = dma.vmem_to_hbm [thread:$0]  %s161_s11, 64, %s287_s1, [#allocation4]  }
  0x74   :  { %235 = dma.done.wait [#allocation4], 64  }
  0x75   :  { %236 = vsyncadd [#allocation4], 4294967232 }
  0x76   :  { %167 = vsyncpa [#allocation3], 1 }
  0x77   :  { %168 = vsyncpa [#allocation4], 1 }

</bundles_post_ra>
